<compile_context>
chip_gen: v6e
topology: v6e:2x2x1
jax: 0.10.0
libtpu: 0.0.40
codegen_flags: <defaults>
</compile_context>

<pallas_src>
import functools

import jax
import jax.numpy as jnp
from jax.experimental import pallas as pl
from jax.experimental.pallas import tpu as pltpu

_BN_EPS = 1e-5
_ACT_DTYPE = jnp.bfloat16      # activations / weights fed to the MXU


def _vmem_limit_bytes():
    # Per-generation VMEM budget: ~3/4 of physical, capped at 100 MiB
    # (v5e/v6e: 128 MiB physical -> 96 MiB; v7x: 64 MiB physical -> 48 MiB).
    try:
        cap = pltpu.get_tpu_info().vmem_capacity_bytes
    except Exception:
        cap = 64 * 1024 * 1024
    return int(min(cap * 3 // 4, 100 * 1024 * 1024))


_VMEM_LIMIT = _vmem_limit_bytes()


def _rup(x, m):
    return -(-x // m) * m


def _pick_tile(dim, max_tile, quantum):
    """Largest multiple of `quantum` dividing `dim`, capped at `max_tile`.

    Precondition: dim % quantum == 0 and dim >= quantum.
    """
    t = min(dim, max_tile)
    t -= t % quantum
    while dim % t:
        t -= quantum
    return t


# ----------------------------- Pallas kernels ------------------------------ #

def _make_gemm_kernel(relu, has_residual):
    """GEMM + folded-BN (+ residual) (+ ReLU) with an f32 VMEM accumulator."""

    def body(x_ref, w_ref, s_ref, b_ref, r_ref, o_ref, acc_ref):
        k = pl.program_id(2)

        @pl.when(k == 0)
        def _():
            acc_ref[...] = jnp.zeros_like(acc_ref)

        acc_ref[...] += jnp.dot(x_ref[...], w_ref[...],
                                preferred_element_type=jnp.float32)

        @pl.when(k == pl.num_programs(2) - 1)
        def _():
            y = acc_ref[...] * s_ref[...] + b_ref[...]
            if r_ref is not None:
                y = y + r_ref[...].astype(jnp.float32)
            if relu:
                y = jnp.maximum(y, 0.0)
            o_ref[...] = y.astype(o_ref.dtype)

    if has_residual:
        def kernel(x_ref, w_ref, s_ref, b_ref, r_ref, o_ref, acc_ref):
            body(x_ref, w_ref, s_ref, b_ref, r_ref, o_ref, acc_ref)
    else:
        def kernel(x_ref, w_ref, s_ref, b_ref, o_ref, acc_ref):
            body(x_ref, w_ref, s_ref, b_ref, None, o_ref, acc_ref)
    return kernel


def _max3_kernel(a_ref, b_ref, c_ref, o_ref):
    o_ref[...] = jnp.maximum(jnp.maximum(a_ref[...], b_ref[...]), c_ref[...])


# ----------------------------- Pallas wrappers ----------------------------- #

def _gemm_bn(x, w, scale, bias, residual, *, relu, n_out):
    """maybe_relu((x @ w) * scale + bias [+ residual]) as a tiled MXU GEMM.

    `w`/`scale`/`bias` are pre-padded at init to (Kp, Np)/(1, Np), Kp/Np
    multiples of 128.  Activations are padded here only when needed.
    """
    M, K = x.shape
    Kp, Np = w.shape
    N = n_out
    Mp = _rup(M, 8)

    x = x.astype(_ACT_DTYPE)
    if Mp != M or Kp != K:
        x = jnp.pad(x, ((0, Mp - M), (0, Kp - K)))
    has_res = residual is not None
    if has_res:
        residual = residual.astype(_ACT_DTYPE)
        if Mp != M or Np != N:
            residual = jnp.pad(residual, ((0, Mp - M), (0, Np - N)))

    tm = _pick_tile(Mp, 512, 8)
    tn = _pick_tile(Np, 512 if Mp <= 64 else 256, 128)  # lane-dense output tiles
    tk = _pick_tile(Kp, 512, 128)
    grid = (Mp // tm, Np // tn, Kp // tk)

    in_specs = [
        pl.BlockSpec((tm, tk), lambda i, j, k: (i, k)),
        pl.BlockSpec((tk, tn), lambda i, j, k: (k, j)),
        pl.BlockSpec((1, tn), lambda i, j, k: (0, j)),
        pl.BlockSpec((1, tn), lambda i, j, k: (0, j)),
    ]
    args = [x, w, scale, bias]
    if has_res:
        in_specs.append(pl.BlockSpec((tm, tn), lambda i, j, k: (i, j)))
        args.append(residual)

    out = pl.pallas_call(
        _make_gemm_kernel(relu, has_res),
        out_shape=jax.ShapeDtypeStruct((Mp, Np), _ACT_DTYPE),
        grid_spec=pltpu.PrefetchScalarGridSpec(
            num_scalar_prefetch=0,
            grid=grid,
            in_specs=in_specs,
            out_specs=pl.BlockSpec((tm, tn), lambda i, j, k: (i, j)),
            scratch_shapes=[pltpu.VMEM((tm, tn), jnp.float32)],
        ),
        compiler_params=pltpu.CompilerParams(
            dimension_semantics=("parallel", "parallel", "arbitrary"),
            vmem_limit_bytes=_VMEM_LIMIT),
    )(*args)

    if Mp != M or Np != N:
        out = out[:M, :N]
    return out


def _max3(a, b, c):
    """Elementwise max of three (M, C) tensors, gridded over rows."""
    M, C = a.shape
    Mp = _rup(M, 8)
    if Mp != M:
        pad = ((0, Mp - M), (0, 0))
        a, b, c = jnp.pad(a, pad), jnp.pad(b, pad), jnp.pad(c, pad)
    tm = _pick_tile(Mp, 512, 8)
    out = pl.pallas_call(
        _max3_kernel,
        out_shape=jax.ShapeDtypeStruct((Mp, C), a.dtype),
        grid_spec=pltpu.PrefetchScalarGridSpec(
            num_scalar_prefetch=0,
            grid=(Mp // tm,),
            in_specs=[pl.BlockSpec((tm, C), lambda i: (i, 0))] * 3,
            out_specs=pl.BlockSpec((tm, C), lambda i: (i, 0)),
        ),
        compiler_params=pltpu.CompilerParams(
            dimension_semantics=("parallel",),
            vmem_limit_bytes=_VMEM_LIMIT),
    )(a, b, c)
    return out if Mp == M else out[:M]


@jax.jit
def maxpool_3x3_s2_p1(x):
    """3x3 / stride-2 / pad-1 max pool, separable (W-taps then H-taps)."""
    B, H, W, C = x.shape
    Ho = (H + 2 - 3) // 2 + 1
    Wo = (W + 2 - 3) // 2 + 1
    Hp = H + 2
    xp = jnp.pad(x, ((0, 0), (1, 1), (1, 1), (0, 0)),
                 constant_values=-jnp.inf)
    cols = [xp[:, :, j:j + 2 * (Wo - 1) + 1:2, :].reshape(B * Hp * Wo, C)
            for j in range(3)]
    t = _max3(*cols).reshape(B, Hp, Wo, C)
    rows = [t[:, i:i + 2 * (Ho - 1) + 1:2, :, :].reshape(B * Ho * Wo, C)
            for i in range(3)]
    return _max3(*rows).reshape(B, Ho, Wo, C)


@functools.partial(jax.jit,
                   static_argnames=("kh", "kw", "stride", "relu", "cout"))
def _conv_bn_impl(x, w, scale, bias, residual, *, kh, kw, stride, relu, cout):
    """Conv (square kernel, pad=(k-1)//2) + folded BN (+residual, +ReLU).

    All the im2col / padding / reshape glue lives inside this jit so XLA can
    fuse it with the Pallas GEMM instead of running eager op-by-op.
    """
    B, H, W, C = x.shape
    pad = (kh - 1) // 2
    Ho = (H + 2 * pad - kh) // stride + 1
    Wo = (W + 2 * pad - kw) // stride + 1
    if kh == 1 and kw == 1:
        xs = x if stride == 1 else x[:, ::stride, ::stride, :]
        cols = xs.reshape(B * Ho * Wo, C)
    else:
        # TODO(synk): im2col for 3x3/7x7 convs still materializes kh*kw shifted
        # copies in HBM; a windowed-BlockSpec direct conv would avoid this.
        xp = jnp.pad(x, ((0, 0), (pad, pad), (pad, pad), (0, 0))) if pad else x
        taps = []
        for i in range(kh):
            for j in range(kw):
                taps.append(xp[:, i:i + stride * (Ho - 1) + 1:stride,
                               j:j + stride * (Wo - 1) + 1:stride, :])
        cols = jnp.concatenate(taps, axis=-1).reshape(B * Ho * Wo, kh * kw * C)
    res2d = residual.reshape(B * Ho * Wo, cout) if residual is not None else None
    y = _gemm_bn(cols, w, scale, bias, res2d, relu=relu, n_out=cout)
    return y.reshape(B, Ho, Wo, cout)


def conv_bn_forward(x, p, stride, relu, residual=None):
    return _conv_bn_impl(x, p["w"], p["scale"], p["bias"], residual,
                         kh=p["kh"], kw=p["kw"], stride=stride, relu=relu,
                         cout=p["cout"])


# ------------------------- parameter initialization ------------------------ #

def init_conv_bn(key, kh, kw, cin, cout):
    """Conv weight + folded inference BatchNorm, pre-padded to MXU tiles.

    Weight is stored flattened as (Kp, Np) bf16 (Kp = roundup(kh*kw*cin, 128),
    Np = roundup(cout, 128)); scale/bias are (1, Np) f32.
    """
    k1, k2, k3, k4, k5 = jax.random.split(key, 5)
    K = kh * kw * cin
    w = jax.random.normal(k1, (K, cout), jnp.float32) * jnp.sqrt(2.0 / K)
    gamma = jax.random.uniform(k2, (cout,), minval=0.5, maxval=1.5)
    beta = jax.random.normal(k3, (cout,)) * 0.1
    mean = jax.random.normal(k4, (cout,)) * 0.1
    var = jax.random.uniform(k5, (cout,), minval=0.5, maxval=1.5)
    scale = gamma / jnp.sqrt(var + _BN_EPS)
    bias = beta - mean * scale
    Kp, Np = _rup(K, 128), _rup(cout, 128)
    wp = jnp.pad(w, ((0, Kp - K), (0, Np - cout))).astype(_ACT_DTYPE)
    sp = jnp.pad(scale, (0, Np - cout)).reshape(1, Np).astype(jnp.float32)
    bp = jnp.pad(bias, (0, Np - cout)).reshape(1, Np).astype(jnp.float32)
    return {"w": wp, "scale": sp, "bias": bp,
            "kh": kh, "kw": kw, "cin": cin, "cout": cout}


def init_bottleneck(key, inplanes, planes, stride, need_down):
    k1, k2, k3, k4 = jax.random.split(key, 4)
    p = {
        "conv1": init_conv_bn(k1, 1, 1, inplanes, planes),
        "conv2": init_conv_bn(k2, 3, 3, planes, planes),
        "conv3": init_conv_bn(k3, 1, 1, planes, planes * 4),
        "stride": stride,
    }
    if need_down:
        p["down"] = init_conv_bn(k4, 1, 1, inplanes, planes * 4)
    return p


def init_resnet101(key):
    params = {"stem": init_conv_bn(jax.random.fold_in(key, 0), 7, 7, 3, 64)}
    layer_defs = [(64, 3, 1), (128, 4, 2), (256, 23, 2), (512, 3, 2)]
    inplanes = 64
    for li, (planes, nblocks, stride) in enumerate(layer_defs):
        blocks = []
        for bi in range(nblocks):
            bkey = jax.random.fold_in(key, 1000 * (li + 1) + bi)
            s = stride if bi == 0 else 1
            need_down = (bi == 0) and (s != 1 or inplanes != planes * 4)
            blocks.append(init_bottleneck(bkey, inplanes, planes, s, need_down))
            inplanes = planes * 4
        params[f"layer{li + 1}"] = blocks
    return params


# --------------------------------- forward --------------------------------- #

def bottleneck_forward(x, p):
    out = conv_bn_forward(x, p["conv1"], 1, relu=True)
    out = conv_bn_forward(out, p["conv2"], p["stride"], relu=True)
    if "down" in p:
        identity = conv_bn_forward(x, p["down"], p["stride"], relu=False)
    else:
        identity = x
    # conv3 + BN + residual add + ReLU fused in a single GEMM epilogue.
    return conv_bn_forward(out, p["conv3"], 1, relu=True, residual=identity)


def baseline_forward(x_nhwc, params):
    x = conv_bn_forward(x_nhwc, params["stem"], stride=2, relu=True)  # conv1+bn1+relu
    x = maxpool_3x3_s2_p1(x)                                          # maxpool
    feats = []
    for li in range(4):
        for bp in params[f"layer{li + 1}"]:
            x = bottleneck_forward(x, bp)
        feats.append(x)
    return tuple(feats)  # feature1..feature4 (NHWC, bf16)


# ----------------------------------- main ----------------------------------- #

if __name__ == "__main__":
    key = jax.random.PRNGKey(0)
    pkey, xkey = jax.random.split(key)

    # Small-but-consistent input: NCHW like the PyTorch module (RGB, 32x32).
    x_nchw = jax.random.normal(xkey, (2, 3, 32, 32), jnp.float32)
    x_nhwc = jnp.transpose(x_nchw, (0, 2, 3, 1)).astype(_ACT_DTYPE)

    params = init_resnet101(pkey)

    f1, f2, f3, f4 = baseline_forward(x_nhwc, params)

    # Back to PyTorch's NCHW (f32) convention for the returned features.
    feats_nchw = tuple(jnp.transpose(f, (0, 3, 1, 2)).astype(jnp.float32)
                       for f in (f1, f2, f3, f4))
    for f in feats_nchw:
        jax.block_until_ready(f)

    expected = [(2, 256, 8, 8), (2, 512, 4, 4), (2, 1024, 2, 2), (2, 2048, 1, 1)]
    assert [tuple(f.shape) for f in feats_nchw] == expected, \
        [tuple(f.shape) for f in feats_nchw]
    assert all(bool(jnp.all(jnp.isfinite(f))) for f in feats_nchw)

    print("KERNEL_OK")
</pallas_src>

<mosaic_0001>
module attributes {stable_mosaic.version = 11 : i64} {
  func.func @kernel(%arg0: i32, %arg1: i32, %arg2: i32, %arg3: memref<512x256xbf16, #tpu.memory_space<vmem>>, %arg4: memref<256x128xbf16, #tpu.memory_space<vmem>>, %arg5: memref<1x128xf32, #tpu.memory_space<vmem>>, %arg6: memref<1x128xf32, #tpu.memory_space<vmem>>, %arg7: memref<512x128xbf16, #tpu.memory_space<vmem>>, %arg8: memref<512x128xf32, #tpu.memory_space<vmem>>) attributes {dimension_semantics = [#tpu.dimension_semantics<parallel>, #tpu.dimension_semantics<parallel>, #tpu.dimension_semantics<arbitrary>], iteration_bounds = array<i64: 1, 1, 1>, scalar_prefetch = 0 : i64, scratch_operands = 1 : i64, tpu.core_type = #tpu.core_type<tc>, window_params = [{transform_indices = @transform_0, window_bounds = array<i64: 512, 256>}, {transform_indices = @transform_1, window_bounds = array<i64: 256, 128>}, {transform_indices = @transform_2, window_bounds = array<i64: 1, 128>}, {transform_indices = @transform_3, window_bounds = array<i64: 1, 128>}, {transform_indices = @transform_4, window_bounds = array<i64: 512, 128>}]} {
    %c0_i32 = arith.constant 0 : i32
    %0 = arith.cmpi eq, %arg2, %c0_i32 : i32
    %1 = arith.extui %0 : i1 to i32
    %c0_i32_0 = arith.constant 0 : i32
    %2 = arith.cmpi ne, %1, %c0_i32_0 : i32
    scf.if %2 {
      %cst_10 = arith.constant 0.000000e+00 : f32
      %12 = vector.broadcast %cst_10 : f32 to vector<512x128xf32>
      %c0_11 = arith.constant 0 : index
      %c0_12 = arith.constant 0 : index
      %13 = vector.load %arg8[%c0_11, %c0_12] : memref<512x128xf32, #tpu.memory_space<vmem>>, vector<512x128xf32>
      tpu.vector_store %arg8[%c0_11, %c0_12], %12 {strides = array<i32>} : memref<512x128xf32, #tpu.memory_space<vmem>>, vector<512x128xf32>,
    } else {
    }
    %c0 = arith.constant 0 : index
    %c0_1 = arith.constant 0 : index
    %3 = vector.load %arg8[%c0, %c0_1] : memref<512x128xf32, #tpu.memory_space<vmem>>, vector<512x128xf32>
    %c0_2 = arith.constant 0 : index
    %c0_3 = arith.constant 0 : index
    %4 = vector.load %arg3[%c0_2, %c0_3] : memref<512x256xbf16, #tpu.memory_space<vmem>>, vector<512x256xbf16>
    %c0_4 = arith.constant 0 : index
    %c0_5 = arith.constant 0 : index
    %5 = vector.load %arg4[%c0_4, %c0_5] : memref<256x128xbf16, #tpu.memory_space<vmem>>, vector<256x128xbf16>
    %cst = arith.constant dense<0.000000e+00> : vector<512x128xf32>
    %6 = tpu.matmul %4, %5, %cst {dimension_numbers = #tpu.dot_dimension_numbers<[1], [0], [0], [1], [0, 0, 1, 1], [], []>} : vector<512x256xbf16>, vector<256x128xbf16>, vector<512x128xf32> -> vector<512x128xf32>
    %7 = arith.addf %3, %6 : vector<512x128xf32>
    %c0_6 = arith.constant 0 : index
    %c0_7 = arith.constant 0 : index
    %8 = vector.load %arg8[%c0_6, %c0_7] : memref<512x128xf32, #tpu.memory_space<vmem>>, vector<512x128xf32>
    tpu.vector_store %arg8[%c0_6, %c0_7], %7 {strides = array<i32>} : memref<512x128xf32, #tpu.memory_space<vmem>>, vector<512x128xf32>,
    %c0_i32_8 = arith.constant 0 : i32
    %9 = arith.cmpi eq, %arg2, %c0_i32_8 : i32
    %10 = arith.extui %9 : i1 to i32
    %c0_i32_9 = arith.constant 0 : i32
    %11 = arith.cmpi ne, %10, %c0_i32_9 : i32
    scf.if %11 {
      %c0_10 = arith.constant 0 : index
      %c0_11 = arith.constant 0 : index
      %12 = vector.load %arg8[%c0_10, %c0_11] : memref<512x128xf32, #tpu.memory_space<vmem>>, vector<512x128xf32>
      %c0_12 = arith.constant 0 : index
      %c0_13 = arith.constant 0 : index
      %13 = vector.load %arg5[%c0_12, %c0_13] : memref<1x128xf32, #tpu.memory_space<vmem>>, vector<1x128xf32>
      %14 = vector.broadcast %13 : vector<1x128xf32> to vector<512x128xf32>
      %15 = arith.mulf %12, %14 : vector<512x128xf32>
      %c0_14 = arith.constant 0 : index
      %c0_15 = arith.constant 0 : index
      %16 = vector.load %arg6[%c0_14, %c0_15] : memref<1x128xf32, #tpu.memory_space<vmem>>, vector<1x128xf32>
      %17 = vector.broadcast %16 : vector<1x128xf32> to vector<512x128xf32>
      %18 = arith.addf %15, %17 : vector<512x128xf32>
      %cst_16 = arith.constant 0.000000e+00 : f32
      %19 = vector.broadcast %cst_16 : f32 to vector<512x128xf32>
      %20 = arith.maximumf %18, %19 : vector<512x128xf32>
      %21 = arith.truncf %20 : vector<512x128xf32> to vector<512x128xbf16>
      %c0_17 = arith.constant 0 : index
      %c0_18 = arith.constant 0 : index
      %22 = vector.load %arg7[%c0_17, %c0_18] : memref<512x128xbf16, #tpu.memory_space<vmem>>, vector<512x128xbf16>
      tpu.vector_store %arg7[%c0_17, %c0_18], %21 {strides = array<i32>} : memref<512x128xbf16, #tpu.memory_space<vmem>>, vector<512x128xbf16>,
    } else {
    }
    return
  }
  func.func @transform_0(%arg0: i32, %arg1: i32, %arg2: i32) -> (i32, i32) {
    %c0_i32 = arith.constant 0 : i32
    return %arg0, %arg2 : i32, i32
  }
  func.func @transform_1(%arg0: i32, %arg1: i32, %arg2: i32) -> (i32, i32) {
    %c0_i32 = arith.constant 0 : i32
    return %arg2, %arg1 : i32, i32
  }
  func.func @transform_2(%arg0: i32, %arg1: i32, %arg2: i32) -> (i32, i32) {
    %c0_i32 = arith.constant 0 : i32
    %c0_i32_0 = arith.constant 0 : i32
    return %c0_i32, %arg1 : i32, i32
  }
  func.func @transform_3(%arg0: i32, %arg1: i32, %arg2: i32) -> (i32, i32) {
    %c0_i32 = arith.constant 0 : i32
    %c0_i32_0 = arith.constant 0 : i32
    return %c0_i32, %arg1 : i32, i32
  }
  func.func @transform_4(%arg0: i32, %arg1: i32, %arg2: i32) -> (i32, i32) {
    %c0_i32 = arith.constant 0 : i32
    return %arg0, %arg1 : i32, i32
  }
}

</mosaic_0001>

<bundles_post_ra>
// kernel: _conv_bn_impl.1
= control target key start
LH: loop header
LB: loop body
LE: loop exit
PB: predicated region body
PF: predicated region fallthrough
CT: control target
= control target key end

     0   :  { %v2260_v1 = vmov 0   ;;  %s2702_s0 = inlined_call_operand.vmem [shape: bf16[512,256], index: 0, kind: input, shape index: {}]   ;;  %s2703_s1 = inlined_call_operand.vmem [shape: bf16[256,128], index: 1, kind: input, shape index: {}]   ;;  %s2704_s2 = inlined_call_operand.vmem [shape: f32[1,128], index: 2, kind: input, shape index: {}]   ;;  %s2705_s3 = inlined_call_operand.vmem [shape: f32[1,128], index: 3, kind: input, shape index: {}]   ;;  %s2706_s4 = inlined_call_operand.hbm [shape: bf16[512,128], index: 4, kind: output, shape index: {}]  }
   0x1   :  { %v2126_v0 = vld [vmem:[%s2703_s1 + $0x38] sm:$0xff]   ;;  %663 = vmatprep.subr.bf16.mxu0 %v2260_v1  ;;  %2090 = vmatprep.subr.bf16.mxu1 %v2260_v1  ;;  %v2127_v2 = vld [vmem:[%s2703_s1 + $0x30] sm:$0xff]   ;;  %v2128_v3 = vld [vmem:[%s2703_s1 + $0x28] sm:$0xff]  }
   0x2   :  { %664 = vmatpush1.bf16.msra.mxu0 %v2126_v0  ;;  %2106 = vmatpush1.bf16.msra.mxu1 %v2126_v0  ;;  %v2129_v4 = vld [vmem:[%s2703_s1 + $0x20] sm:$0xff]   ;;  %v2130_v5 = vld [vmem:[%s2703_s1 + $0x18] sm:$0xff]   ;;  %v2131_v7 = vld [vmem:[%s2703_s1 + $0x10] sm:$0xff]  }
   0x3   :  { %665 = vmatprep.subr.bf16.mxu0 %v2260_v1  ;;  %2091 = vmatprep.subr.bf16.mxu1 %v2260_v1  ;;  %v2144_v6 = vld [vmem:[%s2702_s0 + $0x4] ss:$8 sps:$4 sm:$0xff]   ;;  %v2134_v11 = vld [vmem:[%s2703_s1 + $0x78] sm:$0xff]   ;;  %v2135_v12 = vld [vmem:[%s2703_s1 + $0x70] sm:$0xff]  }
   0x4   :  { %v2147_v8 = vld [vmem:[%s2702_s0 + $0x104] ss:$8 sps:$4 sm:$0xff]   ;;  %695 = vmatprep.mubr.bf16.mxu0 %v2144_v6  ;;  %v2138_v15 = vld [vmem:[%s2703_s1 + $0x58] sm:$0xff]   ;;  %v2139_v16 = vld [vmem:[%s2703_s1 + $0x50] sm:$0xff]  }
   0x5   :  { %823 = vmatprep.mubr.bf16.mxu1 %v2147_v8  ;;  %v2132_v9 = vld [vmem:[%s2703_s1 + $0x8] sm:$0xff]   ;;  %v2133_v10 = vld [vmem:[%s2703_s1] sm:$0xff]  }
   0x6   :  { %666 = vmatpush1.bf16.msra.mxu0 %v2127_v2  ;;  %2107 = vmatpush1.bf16.msra.mxu1 %v2127_v2  ;;  %v2136_v13 = vld [vmem:[%s2703_s1 + $0x68] sm:$0xff]   ;;  %v2137_v14 = vld [vmem:[%s2703_s1 + $0x60] sm:$0xff]  }
   0x7   :  { %667 = vmatprep.subr.bf16.mxu0 %v2260_v1  ;;  %2092 = vmatprep.subr.bf16.mxu1 %v2260_v1  ;;  %v2140_v17 = vld [vmem:[%s2703_s1 + $0x48] sm:$0xff]   ;;  %v2141_v18 = vld [vmem:[%s2703_s1 + $0x40] sm:$0xff]  }
   0xa   :  { %668 = vmatpush1.bf16.msra.mxu0 %v2128_v3  ;;  %2108 = vmatpush1.bf16.msra.mxu1 %v2128_v3 }
   0xb   :  { %669 = vmatprep.subr.bf16.mxu0 %v2260_v1  ;;  %2093 = vmatprep.subr.bf16.mxu1 %v2260_v1 }
   0xe   :  { %670 = vmatpush1.bf16.msra.mxu0 %v2129_v4  ;;  %2109 = vmatpush1.bf16.msra.mxu1 %v2129_v4 }
   0xf   :  { %671 = vmatprep.subr.bf16.mxu0 %v2260_v1  ;;  %2094 = vmatprep.subr.bf16.mxu1 %v2260_v1 }
  0x12   :  { %672 = vmatpush1.bf16.msra.mxu0 %v2130_v5  ;;  %2110 = vmatpush1.bf16.msra.mxu1 %v2130_v5 }
  0x13   :  { %673 = vmatprep.subr.bf16.mxu0 %v2260_v1  ;;  %2095 = vmatprep.subr.bf16.mxu1 %v2260_v1 }
  0x16   :  { %674 = vmatpush1.bf16.msra.mxu0 %v2131_v7  ;;  %2111 = vmatpush1.bf16.msra.mxu1 %v2131_v7 }
  0x17   :  { %675 = vmatprep.subr.bf16.mxu0 %v2260_v1  ;;  %2096 = vmatprep.subr.bf16.mxu1 %v2260_v1 }
  0x1a   :  { %676 = vmatpush1.bf16.msra.mxu0 %v2132_v9  ;;  %2112 = vmatpush1.bf16.msra.mxu1 %v2132_v9 }
  0x1b   :  { %677 = vmatprep.subr.bf16.mxu0 %v2260_v1  ;;  %2097 = vmatprep.subr.bf16.mxu1 %v2260_v1 }
  0x1e   :  { %678 = vmatpush1.bf16.msra.mxu0 %v2133_v10  ;;  %2113 = vmatpush1.bf16.msra.mxu1 %v2133_v10 }
  0x1f   :  { %679 = vmatprep.subr.bf16.mxu0 %v2260_v1  ;;  %2098 = vmatprep.subr.bf16.mxu1 %v2260_v1 }
  0x22   :  { %680 = vmatpush2.bf16.msra.mxu0 %v2134_v11  ;;  %2114 = vmatpush2.bf16.msra.mxu1 %v2134_v11 }
  0x23   :  { %681 = vmatprep.subr.bf16.mxu0 %v2260_v1  ;;  %2099 = vmatprep.subr.bf16.mxu1 %v2260_v1 }
  0x26   :  { %682 = vmatpush2.bf16.msra.mxu0 %v2135_v12  ;;  %2115 = vmatpush2.bf16.msra.mxu1 %v2135_v12 }
  0x27   :  { %683 = vmatprep.subr.bf16.mxu0 %v2260_v1  ;;  %2100 = vmatprep.subr.bf16.mxu1 %v2260_v1 }
  0x2a   :  { %684 = vmatpush2.bf16.msra.mxu0 %v2136_v13  ;;  %2116 = vmatpush2.bf16.msra.mxu1 %v2136_v13 }
  0x2b   :  { %685 = vmatprep.subr.bf16.mxu0 %v2260_v1  ;;  %2101 = vmatprep.subr.bf16.mxu1 %v2260_v1 }
  0x2e   :  { %686 = vmatpush2.bf16.msra.mxu0 %v2137_v14  ;;  %2117 = vmatpush2.bf16.msra.mxu1 %v2137_v14 }
  0x2f   :  { %687 = vmatprep.subr.bf16.mxu0 %v2260_v1  ;;  %2102 = vmatprep.subr.bf16.mxu1 %v2260_v1 }
  0x32   :  { %688 = vmatpush2.bf16.msra.mxu0 %v2138_v15  ;;  %2118 = vmatpush2.bf16.msra.mxu1 %v2138_v15 }
  0x33   :  { %689 = vmatprep.subr.bf16.mxu0 %v2260_v1  ;;  %2103 = vmatprep.subr.bf16.mxu1 %v2260_v1 }
  0x36   :  { %690 = vmatpush2.bf16.msra.mxu0 %v2139_v16  ;;  %2119 = vmatpush2.bf16.msra.mxu1 %v2139_v16 }
  0x37   :  { %691 = vmatprep.subr.bf16.mxu0 %v2260_v1  ;;  %2104 = vmatprep.subr.bf16.mxu1 %v2260_v1 }
  0x3a   :  { %692 = vmatpush2.bf16.msra.mxu0 %v2140_v17  ;;  %2120 = vmatpush2.bf16.msra.mxu1 %v2140_v17 }
  0x3b   :  { %9 = vsyncpa [#allocation4], 0  ;;  %693 = vmatprep.subr.bf16.mxu0 %v2260_v1  ;;  %2105 = vmatprep.subr.bf16.mxu1 %v2260_v1  ;;  %v2142_v19 = vld [vmem:[%s2702_s0] ss:$8 sps:$4 sm:$0xff]   ;;  %v2148_v21 = vld [vmem:[%s2702_s0 + $0x14] ss:$8 sps:$4 sm:$0xff]  }
  0x3c   :  { %v2145_v20 = vld [vmem:[%s2702_s0 + $0x100] ss:$8 sps:$4 sm:$0xff]   ;;  %v2150_v22 = vld [vmem:[%s2702_s0 + $0x114] ss:$8 sps:$4 sm:$0xff]   ;;  %v2152_v23 = vld [vmem:[%s2702_s0 + $0x10] ss:$8 sps:$4 sm:$0xff]  }
  0x3d   :  { %v2153_v24 = vld [vmem:[%s2702_s0 + $0x110] ss:$8 sps:$4 sm:$0xff]   ;;  %v2154_v25 = vld [vmem:[%s2702_s0 + $0x24] ss:$8 sps:$4 sm:$0xff]   ;;  %v2158_v27 = vld [vmem:[%s2702_s0 + $0x20] ss:$8 sps:$4 sm:$0xff]  }
  0x3e   :  { %694 = vmatpush2.bf16.msra.mxu0 %v2141_v18  ;;  %2121 = vmatpush2.bf16.msra.mxu1 %v2141_v18  ;;  %v2156_v26 = vld [vmem:[%s2702_s0 + $0x124] ss:$8 sps:$4 sm:$0xff]   ;;  %v2159_v28 = vld [vmem:[%s2702_s0 + $0x120] ss:$8 sps:$4 sm:$0xff]   ;;  %v2160_v29 = vld [vmem:[%s2702_s0 + $0x34] ss:$8 sps:$4 sm:$0xff]  }
  0x3f   :  { %v2162_v30 = vld [vmem:[%s2702_s0 + $0x134] ss:$8 sps:$4 sm:$0xff]   ;;  %v2164_v31 = vld [vmem:[%s2702_s0 + $0x30] ss:$8 sps:$4 sm:$0xff]   ;;  %v2166_v33 = vld [vmem:[%s2702_s0 + $0x44] ss:$8 sps:$4 sm:$0xff]  }
  0x40   :  { %v2165_v32 = vld [vmem:[%s2702_s0 + $0x130] ss:$8 sps:$4 sm:$0xff]   ;;  %v2168_v34 = vld [vmem:[%s2702_s0 + $0x144] ss:$8 sps:$4 sm:$0xff]   ;;  %v2170_v35 = vld [vmem:[%s2702_s0 + $0x40] ss:$8 sps:$4 sm:$0xff]  }
  0x41   :  { %696 = vmatmul.mubr.bf16.vlgmr.msra.gmra.mxu0 %v2142_v19  ;;  %824 = vmatmul.mubr.bf16.vlgmr.msra.gmra.mxu1 %v2145_v20  ;;  %v2171_v36 = vld [vmem:[%s2702_s0 + $0x140] ss:$8 sps:$4 sm:$0xff]   ;;  %v2172_v37 = vld [vmem:[%s2702_s0 + $0x54] ss:$8 sps:$4 sm:$0xff]   ;;  %v2176_v39 = vld [vmem:[%s2702_s0 + $0x50] ss:$8 sps:$4 sm:$0xff]  }
  0x42   :  { %703 = vmatprep.mubr.bf16.mxu0 %v2148_v21  ;;  %831 = vmatprep.mubr.bf16.mxu1 %v2150_v22  ;;  %v2174_v38 = vld [vmem:[%s2702_s0 + $0x154] ss:$8 sps:$4 sm:$0xff]   ;;  %v2177_v40 = vld [vmem:[%s2702_s0 + $0x150] ss:$8 sps:$4 sm:$0xff]   ;;  %v2178_v41 = vld [vmem:[%s2702_s0 + $0x64] ss:$8 sps:$4 sm:$0xff]  }
  0x43   :  { %v2180_v42 = vld [vmem:[%s2702_s0 + $0x164] ss:$8 sps:$4 sm:$0xff]   ;;  %v2182_v43 = vld [vmem:[%s2702_s0 + $0x60] ss:$8 sps:$4 sm:$0xff]   ;;  %v2184_v45 = vld [vmem:[%s2702_s0 + $0x74] ss:$8 sps:$4 sm:$0xff]  }
  0x44   :  { %v2183_v44 = vld [vmem:[%s2702_s0 + $0x160] ss:$8 sps:$4 sm:$0xff]   ;;  %v2186_v46 = vld [vmem:[%s2702_s0 + $0x174] ss:$8 sps:$4 sm:$0xff]   ;;  %v2188_v47 = vld [vmem:[%s2702_s0 + $0x70] ss:$8 sps:$4 sm:$0xff]  }
  0x45   :  { %v2189_v48 = vld [vmem:[%s2702_s0 + $0x170] ss:$8 sps:$4 sm:$0xff]   ;;  %v2190_v49 = vld [vmem:[%s2702_s0 + $0x84] ss:$8 sps:$4 sm:$0xff]   ;;  %v2194_v51 = vld [vmem:[%s2702_s0 + $0x80] ss:$8 sps:$4 sm:$0xff]  }
  0x46   :  { %v2192_v50 = vld [vmem:[%s2702_s0 + $0x184] ss:$8 sps:$4 sm:$0xff]   ;;  %v2195_v52 = vld [vmem:[%s2702_s0 + $0x180] ss:$8 sps:$4 sm:$0xff]   ;;  %v2196_v53 = vld [vmem:[%s2702_s0 + $0x94] ss:$8 sps:$4 sm:$0xff]  }
  0x47   :  { %v2198_v54 = vld [vmem:[%s2702_s0 + $0x194] ss:$8 sps:$4 sm:$0xff]   ;;  %v2200_v55 = vld [vmem:[%s2702_s0 + $0x90] ss:$8 sps:$4 sm:$0xff]   ;;  %v2202_v57 = vld [vmem:[%s2702_s0 + $0xa4] ss:$8 sps:$4 sm:$0xff]  }
  0x48   :  { %v2201_v56 = vld [vmem:[%s2702_s0 + $0x190] ss:$8 sps:$4 sm:$0xff]   ;;  %v2204_v58 = vld [vmem:[%s2702_s0 + $0x1a4] ss:$8 sps:$4 sm:$0xff]   ;;  %v2206_v59 = vld [vmem:[%s2702_s0 + $0xa0] ss:$8 sps:$4 sm:$0xff]  }
  0x49   :  { %704 = vmatmul.mubr.bf16.gmra.mxu0 %v2152_v23  ;;  %832 = vmatmul.mubr.bf16.gmra.mxu1 %v2153_v24  ;;  %v2207_v60 = vld [vmem:[%s2702_s0 + $0x1a0] ss:$8 sps:$4 sm:$0xff]   ;;  %v2208_v61 = vld [vmem:[%s2702_s0 + $0xb4] ss:$8 sps:$4 sm:$0xff]   ;;  %v2212_v63 = vld [vmem:[%s2702_s0 + $0xb0] ss:$8 sps:$4 sm:$0xff]  }
  0x4a   :  { %711 = vmatprep.mubr.bf16.mxu0 %v2154_v25  ;;  %839 = vmatprep.mubr.bf16.mxu1 %v2156_v26  ;;  %v2210_v62 = vld [vmem:[%s2702_s0 + $0x1b4] ss:$8 sps:$4 sm:$0xff]   ;;  %v2213_v0 = vld [vmem:[%s2702_s0 + $0x1b0] ss:$8 sps:$4 sm:$0xff]   ;;  %v2214_v1 = vld [vmem:[%s2702_s0 + $0xc4] ss:$8 sps:$4 sm:$0xff]  }
  0x4b   :  { %v2216_v2 = vld [vmem:[%s2702_s0 + $0x1c4] ss:$8 sps:$4 sm:$0xff]   ;;  %v2218_v3 = vld [vmem:[%s2702_s0 + $0xc0] ss:$8 sps:$4 sm:$0xff]   ;;  %v2220_v5 = vld [vmem:[%s2702_s0 + $0xd4] ss:$8 sps:$4 sm:$0xff]  }
  0x4c   :  { %v2219_v4 = vld [vmem:[%s2702_s0 + $0x1c0] ss:$8 sps:$4 sm:$0xff]   ;;  %v2222_v6 = vld [vmem:[%s2702_s0 + $0x1d4] ss:$8 sps:$4 sm:$0xff]   ;;  %v2224_v7 = vld [vmem:[%s2702_s0 + $0xd0] ss:$8 sps:$4 sm:$0xff]  }
  0x4d   :  { %v2225_v8 = vld [vmem:[%s2702_s0 + $0x1d0] ss:$8 sps:$4 sm:$0xff]   ;;  %v2226_v9 = vld [vmem:[%s2702_s0 + $0xe4] ss:$8 sps:$4 sm:$0xff]   ;;  %v2230_v11 = vld [vmem:[%s2702_s0 + $0xe0] ss:$8 sps:$4 sm:$0xff]  }
  0x4e   :  { %v2228_v10 = vld [vmem:[%s2702_s0 + $0x1e4] ss:$8 sps:$4 sm:$0xff]   ;;  %v2231_v12 = vld [vmem:[%s2702_s0 + $0x1e0] ss:$8 sps:$4 sm:$0xff]   ;;  %v2232_v13 = vld [vmem:[%s2702_s0 + $0xf4] ss:$8 sps:$4 sm:$0xff]  }
  0x4f   :  { %v2234_v14 = vld [vmem:[%s2702_s0 + $0x1f4] ss:$8 sps:$4 sm:$0xff]   ;;  %v2236_v15 = vld [vmem:[%s2702_s0 + $0xf0] ss:$8 sps:$4 sm:$0xff]   ;;  %v2564_v17 = vld [vmem:[%s2704_s2] ss:$0 sm:$0xff] }
  0x50   :  { %v2237_v16 = vld [vmem:[%s2702_s0 + $0x1f0] ss:$8 sps:$4 sm:$0xff]   ;;  %v2570_v21 = vld [vmem:[%s2705_s3] ss:$0 sm:$0xff]  ;;  %s2261_s0 = smov [#allocation3]  }
  0x51   :  { %712 = vmatmul.mubr.bf16.gmra.mxu0 %v2158_v27  ;;  %840 = vmatmul.mubr.bf16.gmra.mxu1 %v2159_v28  ;;  %s1678_s2 = sshll.u32 %s2261_s0, 4  ;;  %s1679_s2 = int_to_ptr.vmem [resolvable:$true] %s1678_s2 }
  0x52   :  { %719 = vmatprep.mubr.bf16.mxu0 %v2160_v29  ;;  %847 = vmatprep.mubr.bf16.mxu1 %v2162_v30  ;;  %s2238_s3 = scalar_lea.vmem %s1679_s2, 4096  ;;  %p2243_p1 = scmp.lt.s32.totalorder %s1679_s2, %s1679_s2 }
  0x53   :  { %p2239_p0 = scmp.ne.s32.totalorder %s1679_s2, %s2238_s3  ;;  %p2244_p2 = scmp.lt.s32.totalorder %s2238_s3, %s2238_s3 }
  0x55   :  { %p2245_p3 = por %p2244_p2, %p2243_p1 }
  0x57   :  { %p2246_p4 = pnand %p2245_p3, %p2239_p0 }
  0x59   :  { %720 = vmatmul.mubr.bf16.gmra.mxu0 %v2164_v31  ;;  %848 = vmatmul.mubr.bf16.gmra.mxu1 %v2165_v32 }
  0x5a   :  { %727 = vmatprep.mubr.bf16.mxu0 %v2166_v33  ;;  %855 = vmatprep.mubr.bf16.mxu1 %v2168_v34 }
  0x61   :  { %728 = vmatmul.mubr.bf16.gmra.mxu0 %v2170_v35  ;;  %856 = vmatmul.mubr.bf16.gmra.mxu1 %v2171_v36 }
  0x62   :  { %735 = vmatprep.mubr.bf16.mxu0 %v2172_v37  ;;  %863 = vmatprep.mubr.bf16.mxu1 %v2174_v38 }
  0x69   :  { %736 = vmatmul.mubr.bf16.gmra.mxu0 %v2176_v39  ;;  %864 = vmatmul.mubr.bf16.gmra.mxu1 %v2177_v40 }
  0x6a   :  { %743 = vmatprep.mubr.bf16.mxu0 %v2178_v41  ;;  %871 = vmatprep.mubr.bf16.mxu1 %v2180_v42 }
  0x71   :  { %744 = vmatmul.mubr.bf16.gmra.mxu0 %v2182_v43  ;;  %872 = vmatmul.mubr.bf16.gmra.mxu1 %v2183_v44 }
  0x72   :  { %751 = vmatprep.mubr.bf16.mxu0 %v2184_v45  ;;  %879 = vmatprep.mubr.bf16.mxu1 %v2186_v46 }
  0x79   :  { %752 = vmatmul.mubr.bf16.gmra.mxu0 %v2188_v47  ;;  %880 = vmatmul.mubr.bf16.gmra.mxu1 %v2189_v48 }
  0x7a   :  { %759 = vmatprep.mubr.bf16.mxu0 %v2190_v49  ;;  %887 = vmatprep.mubr.bf16.mxu1 %v2192_v50 }
  0x81   :  { %760 = vmatmul.mubr.bf16.gmra.mxu0 %v2194_v51  ;;  %888 = vmatmul.mubr.bf16.gmra.mxu1 %v2195_v52 }
  0x82   :  { %767 = vmatprep.mubr.bf16.mxu0 %v2196_v53  ;;  %895 = vmatprep.mubr.bf16.mxu1 %v2198_v54 }
  0x89   :  { %768 = vmatmul.mubr.bf16.gmra.mxu0 %v2200_v55  ;;  %896 = vmatmul.mubr.bf16.gmra.mxu1 %v2201_v56 }
  0x8a   :  { %775 = vmatprep.mubr.bf16.mxu0 %v2202_v57  ;;  %903 = vmatprep.mubr.bf16.mxu1 %v2204_v58 }
  0x91   :  { %776 = vmatmul.mubr.bf16.gmra.mxu0 %v2206_v59  ;;  %904 = vmatmul.mubr.bf16.gmra.mxu1 %v2207_v60 }
  0x92   :  { %783 = vmatprep.mubr.bf16.mxu0 %v2208_v61  ;;  %911 = vmatprep.mubr.bf16.mxu1 %v2210_v62 }
  0x99   :  { %784 = vmatmul.mubr.bf16.gmra.mxu0 %v2212_v63  ;;  %912 = vmatmul.mubr.bf16.gmra.mxu1 %v2213_v0 }
  0x9a   :  { %791 = vmatprep.mubr.bf16.mxu0 %v2214_v1  ;;  %919 = vmatprep.mubr.bf16.mxu1 %v2216_v2 }
  0xa1   :  { %792 = vmatmul.mubr.bf16.gmra.mxu0 %v2218_v3  ;;  %920 = vmatmul.mubr.bf16.gmra.mxu1 %v2219_v4 }
  0xa2   :  { %799 = vmatprep.mubr.bf16.mxu0 %v2220_v5  ;;  %927 = vmatprep.mubr.bf16.mxu1 %v2222_v6 }
  0xa9   :  { %800 = vmatmul.mubr.bf16.gmra.mxu0 %v2224_v7  ;;  %928 = vmatmul.mubr.bf16.gmra.mxu1 %v2225_v8 }
  0xaa   :  { %807 = vmatprep.mubr.bf16.mxu0 %v2226_v9  ;;  %935 = vmatprep.mubr.bf16.mxu1 %v2228_v10 }
  0xb1   :  { %808 = vmatmul.mubr.bf16.gmra.mxu0 %v2230_v11  ;;  %936 = vmatmul.mubr.bf16.gmra.mxu1 %v2231_v12 }
  0xb2   :  { %815 = vmatprep.mubr.bf16.mxu0 %v2232_v13  ;;  %943 = vmatprep.mubr.bf16.mxu1 %v2234_v14 }
  0xb9   :  { %816 = vmatmul.mubr.bf16.gmra.mxu0 %v2236_v15  ;;  %944 = vmatmul.mubr.bf16.gmra.mxu1 %v2237_v16 }
 0x101   :  { %v697_v18 = vpop.f32.mrf.mxu0  ;;  %v825_v19 = vpop.f32.mrf.mxu1 }
 0x102   :  { %v1154_v20 = vmul.f32 %v2564_v17, %v697_v18  ;;  %v1186_v22 = vmul.f32 %v2564_v17, %v825_v19 }
 0x103   :  { %v699_v23 = vpop.f32.mrf.mxu0  ;;  %v827_v24 = vpop.f32.mrf.mxu1 }
 0x104   :  { %v1225_v25 = vadd.f32 %v2570_v21, %v1154_v20  ;;  %v1257_v26 = vadd.f32 %v2570_v21, %v1186_v22 }
 0x105   :  { %v700_v27 = vpop.f32.mrf.mxu0  ;;  %v828_v28 = vpop.f32.mrf.mxu1 }
 0x106   :  { %v1155_v29 = vmul.f32 %v2564_v17, %v700_v27  ;;  %v1187_v30 = vmul.f32 %v2564_v17, %v828_v28  ;;  %v1289_v35 = vmax.f32 %v1225_v25, 0.0  ;;  %v1321_v36 = vmax.f32 %v1257_v26, 0.0 }
 0x107   :  { %v702_v31 = vpop.f32.mrf.mxu0  ;;  %v830_v32 = vpop.f32.mrf.mxu1 }
 0x108   :  { %v1226_v33 = vadd.f32 %v2570_v21, %v1155_v29  ;;  %v1258_v34 = vadd.f32 %v2570_v21, %v1187_v30 }
 0x109   :  { %v705_v37 = vpop.f32.mrf.mxu0  ;;  %v833_v38 = vpop.f32.mrf.mxu1 }
 0x10a   :  { %v1290_v39 = vmax.f32 %v1226_v33, 0.0  ;;  %v1322_v40 = vmax.f32 %v1258_v34, 0.0  ;;  %v1156_v41 = vmul.f32 %v2564_v17, %v705_v37  ;;  %v1188_v42 = vmul.f32 %v2564_v17, %v833_v38 }
 0x10b   :  { %v707_v43 = vpop.f32.mrf.mxu0  ;;  %v835_v44 = vpop.f32.mrf.mxu1 }
 0x10c   :  { %v1902_v45 = vpack.c.bf16 %v1290_v39, %v1289_v35  ;;  %v1982_v46 = vpack.c.bf16 %v1322_v40, %v1321_v36  ;;  %v1227_v47 = vadd.f32 %v2570_v21, %v1156_v41  ;;  %v1259_v48 = vadd.f32 %v2570_v21, %v1188_v42 }
 0x10d   :  { %v708_v49 = vpop.f32.mrf.mxu0  ;;  %v836_v50 = vpop.f32.mrf.mxu1 }
 0x10e   :  { %1903 = vst [vmem:[#allocation3] sm:$0xff] %v1902_v45   ;;  %2074 = vst [vmem:[#allocation3 + $0x80] sm:$0xff] %v1982_v46   ;;  %v1157_v51 = vmul.f32 %v2564_v17, %v708_v49  ;;  %v1189_v52 = vmul.f32 %v2564_v17, %v836_v50  ;;  %v1291_v57 = vmax.f32 %v1227_v47, 0.0  ;;  %v1323_v58 = vmax.f32 %v1259_v48, 0.0 }
 0x10f   :  { %v710_v53 = vpop.f32.mrf.mxu0  ;;  %v838_v54 = vpop.f32.mrf.mxu1 }
 0x110   :  { %v1228_v55 = vadd.f32 %v2570_v21, %v1157_v51  ;;  %v1260_v56 = vadd.f32 %v2570_v21, %v1189_v52 }
 0x111   :  { %v713_v59 = vpop.f32.mrf.mxu0  ;;  %v841_v60 = vpop.f32.mrf.mxu1 }
 0x112   :  { %v1292_v61 = vmax.f32 %v1228_v55, 0.0  ;;  %v1324_v62 = vmax.f32 %v1260_v56, 0.0  ;;  %v1158_v63 = vmul.f32 %v2564_v17, %v713_v59  ;;  %v1190_v0 = vmul.f32 %v2564_v17, %v841_v60 }
 0x113   :  { %v715_v1 = vpop.f32.mrf.mxu0  ;;  %v843_v2 = vpop.f32.mrf.mxu1 }
 0x114   :  { %v1907_v3 = vpack.c.bf16 %v1292_v61, %v1291_v57  ;;  %v1987_v4 = vpack.c.bf16 %v1324_v62, %v1323_v58  ;;  %v1229_v5 = vadd.f32 %v2570_v21, %v1158_v63  ;;  %v1261_v6 = vadd.f32 %v2570_v21, %v1190_v0 }
 0x115   :  { %v716_v7 = vpop.f32.mrf.mxu0  ;;  %v844_v8 = vpop.f32.mrf.mxu1 }
 0x116   :  { %2059 = vst [vmem:[#allocation3 + $0x8] sm:$0xff] %v1907_v3   ;;  %2075 = vst [vmem:[#allocation3 + $0x88] sm:$0xff] %v1987_v4   ;;  %v1159_v9 = vmul.f32 %v2564_v17, %v716_v7  ;;  %v1191_v10 = vmul.f32 %v2564_v17, %v844_v8  ;;  %v1293_v15 = vmax.f32 %v1229_v5, 0.0  ;;  %v1325_v16 = vmax.f32 %v1261_v6, 0.0 }
 0x117   :  { %v718_v11 = vpop.f32.mrf.mxu0  ;;  %v846_v12 = vpop.f32.mrf.mxu1 }
 0x118   :  { %v1230_v13 = vadd.f32 %v2570_v21, %v1159_v9  ;;  %v1262_v14 = vadd.f32 %v2570_v21, %v1191_v10 }
 0x119   :  { %v721_v18 = vpop.f32.mrf.mxu0  ;;  %v849_v19 = vpop.f32.mrf.mxu1 }
 0x11a   :  { %v1294_v20 = vmax.f32 %v1230_v13, 0.0  ;;  %v1326_v22 = vmax.f32 %v1262_v14, 0.0  ;;  %v1160_v23 = vmul.f32 %v2564_v17, %v721_v18  ;;  %v1192_v24 = vmul.f32 %v2564_v17, %v849_v19 }
 0x11b   :  { %v723_v25 = vpop.f32.mrf.mxu0  ;;  %v851_v26 = vpop.f32.mrf.mxu1 }
 0x11c   :  { %v1912_v27 = vpack.c.bf16 %v1294_v20, %v1293_v15  ;;  %v1992_v28 = vpack.c.bf16 %v1326_v22, %v1325_v16  ;;  %v1231_v29 = vadd.f32 %v2570_v21, %v1160_v23  ;;  %v1263_v30 = vadd.f32 %v2570_v21, %v1192_v24 }
 0x11d   :  { %v724_v31 = vpop.f32.mrf.mxu0  ;;  %v852_v32 = vpop.f32.mrf.mxu1 }
 0x11e   :  { %2060 = vst [vmem:[#allocation3 + $0x10] sm:$0xff] %v1912_v27   ;;  %2076 = vst [vmem:[#allocation3 + $0x90] sm:$0xff] %v1992_v28   ;;  %v1161_v33 = vmul.f32 %v2564_v17, %v724_v31  ;;  %v1193_v34 = vmul.f32 %v2564_v17, %v852_v32  ;;  %v1295_v39 = vmax.f32 %v1231_v29, 0.0  ;;  %v1327_v40 = vmax.f32 %v1263_v30, 0.0 }
 0x11f   :  { %v726_v35 = vpop.f32.mrf.mxu0  ;;  %v854_v36 = vpop.f32.mrf.mxu1 }
 0x120   :  { %v1232_v37 = vadd.f32 %v2570_v21, %v1161_v33  ;;  %v1264_v38 = vadd.f32 %v2570_v21, %v1193_v34 }
 0x121   :  { %v729_v41 = vpop.f32.mrf.mxu0  ;;  %v857_v42 = vpop.f32.mrf.mxu1 }
 0x122   :  { %v1296_v43 = vmax.f32 %v1232_v37, 0.0  ;;  %v1328_v44 = vmax.f32 %v1264_v38, 0.0  ;;  %v1162_v45 = vmul.f32 %v2564_v17, %v729_v41  ;;  %v1194_v46 = vmul.f32 %v2564_v17, %v857_v42 }
 0x123   :  { %v731_v47 = vpop.f32.mrf.mxu0  ;;  %v859_v48 = vpop.f32.mrf.mxu1 }
 0x124   :  { %v1917_v49 = vpack.c.bf16 %v1296_v43, %v1295_v39  ;;  %v1997_v50 = vpack.c.bf16 %v1328_v44, %v1327_v40  ;;  %v1233_v51 = vadd.f32 %v2570_v21, %v1162_v45  ;;  %v1265_v52 = vadd.f32 %v2570_v21, %v1194_v46 }
 0x125   :  { %v732_v53 = vpop.f32.mrf.mxu0  ;;  %v860_v54 = vpop.f32.mrf.mxu1 }
 0x126   :  { %2061 = vst [vmem:[#allocation3 + $0x18] sm:$0xff] %v1917_v49   ;;  %2077 = vst [vmem:[#allocation3 + $0x98] sm:$0xff] %v1997_v50   ;;  %v1163_v55 = vmul.f32 %v2564_v17, %v732_v53  ;;  %v1195_v56 = vmul.f32 %v2564_v17, %v860_v54  ;;  %v1297_v61 = vmax.f32 %v1233_v51, 0.0  ;;  %v1329_v62 = vmax.f32 %v1265_v52, 0.0 }
 0x127   :  { %v734_v57 = vpop.f32.mrf.mxu0  ;;  %v862_v58 = vpop.f32.mrf.mxu1 }
 0x128   :  { %v1234_v59 = vadd.f32 %v2570_v21, %v1163_v55  ;;  %v1266_v60 = vadd.f32 %v2570_v21, %v1195_v56 }
 0x129   :  { %v737_v63 = vpop.f32.mrf.mxu0  ;;  %v865_v0 = vpop.f32.mrf.mxu1 }
 0x12a   :  { %v1298_v1 = vmax.f32 %v1234_v59, 0.0  ;;  %v1330_v2 = vmax.f32 %v1266_v60, 0.0  ;;  %v1164_v3 = vmul.f32 %v2564_v17, %v737_v63  ;;  %v1196_v4 = vmul.f32 %v2564_v17, %v865_v0 }
 0x12b   :  { %v739_v5 = vpop.f32.mrf.mxu0  ;;  %v867_v6 = vpop.f32.mrf.mxu1 }
 0x12c   :  { %v1922_v7 = vpack.c.bf16 %v1298_v1, %v1297_v61  ;;  %v2002_v8 = vpack.c.bf16 %v1330_v2, %v1329_v62  ;;  %v1235_v9 = vadd.f32 %v2570_v21, %v1164_v3  ;;  %v1267_v10 = vadd.f32 %v2570_v21, %v1196_v4 }
 0x12d   :  { %v740_v11 = vpop.f32.mrf.mxu0  ;;  %v868_v12 = vpop.f32.mrf.mxu1 }
 0x12e   :  { %2062 = vst [vmem:[#allocation3 + $0x20] sm:$0xff] %v1922_v7   ;;  %2078 = vst [vmem:[#allocation3 + $0xa0] sm:$0xff] %v2002_v8   ;;  %v1165_v13 = vmul.f32 %v2564_v17, %v740_v11  ;;  %v1197_v14 = vmul.f32 %v2564_v17, %v868_v12  ;;  %v1299_v20 = vmax.f32 %v1235_v9, 0.0  ;;  %v1331_v22 = vmax.f32 %v1267_v10, 0.0 }
 0x12f   :  { %v742_v15 = vpop.f32.mrf.mxu0  ;;  %v870_v16 = vpop.f32.mrf.mxu1 }
 0x130   :  { %v1236_v18 = vadd.f32 %v2570_v21, %v1165_v13  ;;  %v1268_v19 = vadd.f32 %v2570_v21, %v1197_v14 }
 0x131   :  { %v745_v23 = vpop.f32.mrf.mxu0  ;;  %v873_v24 = vpop.f32.mrf.mxu1 }
 0x132   :  { %v1300_v25 = vmax.f32 %v1236_v18, 0.0  ;;  %v1332_v26 = vmax.f32 %v1268_v19, 0.0  ;;  %v1166_v27 = vmul.f32 %v2564_v17, %v745_v23  ;;  %v1198_v28 = vmul.f32 %v2564_v17, %v873_v24 }
 0x133   :  { %v747_v29 = vpop.f32.mrf.mxu0  ;;  %v875_v30 = vpop.f32.mrf.mxu1 }
 0x134   :  { %v1927_v31 = vpack.c.bf16 %v1300_v25, %v1299_v20  ;;  %v2007_v32 = vpack.c.bf16 %v1332_v26, %v1331_v22  ;;  %v1237_v33 = vadd.f32 %v2570_v21, %v1166_v27  ;;  %v1269_v34 = vadd.f32 %v2570_v21, %v1198_v28 }
 0x135   :  { %v748_v35 = vpop.f32.mrf.mxu0  ;;  %v876_v36 = vpop.f32.mrf.mxu1 }
 0x136   :  { %2063 = vst [vmem:[#allocation3 + $0x28] sm:$0xff] %v1927_v31   ;;  %2079 = vst [vmem:[#allocation3 + $0xa8] sm:$0xff] %v2007_v32   ;;  %v1167_v37 = vmul.f32 %v2564_v17, %v748_v35  ;;  %v1199_v38 = vmul.f32 %v2564_v17, %v876_v36  ;;  %v1301_v43 = vmax.f32 %v1237_v33, 0.0  ;;  %v1333_v44 = vmax.f32 %v1269_v34, 0.0 }
 0x137   :  { %v750_v39 = vpop.f32.mrf.mxu0  ;;  %v878_v40 = vpop.f32.mrf.mxu1 }
 0x138   :  { %v1238_v41 = vadd.f32 %v2570_v21, %v1167_v37  ;;  %v1270_v42 = vadd.f32 %v2570_v21, %v1199_v38 }
 0x139   :  { %v753_v45 = vpop.f32.mrf.mxu0  ;;  %v881_v46 = vpop.f32.mrf.mxu1 }
 0x13a   :  { %v1302_v47 = vmax.f32 %v1238_v41, 0.0  ;;  %v1334_v48 = vmax.f32 %v1270_v42, 0.0  ;;  %v1168_v49 = vmul.f32 %v2564_v17, %v753_v45  ;;  %v1200_v50 = vmul.f32 %v2564_v17, %v881_v46 }
 0x13b   :  { %v755_v51 = vpop.f32.mrf.mxu0  ;;  %v883_v52 = vpop.f32.mrf.mxu1 }
 0x13c   :  { %v1932_v53 = vpack.c.bf16 %v1302_v47, %v1301_v43  ;;  %v2012_v54 = vpack.c.bf16 %v1334_v48, %v1333_v44  ;;  %v1239_v55 = vadd.f32 %v2570_v21, %v1168_v49  ;;  %v1271_v56 = vadd.f32 %v2570_v21, %v1200_v50 }
 0x13d   :  { %v756_v57 = vpop.f32.mrf.mxu0  ;;  %v884_v58 = vpop.f32.mrf.mxu1 }
 0x13e   :  { %2064 = vst [vmem:[#allocation3 + $0x30] sm:$0xff] %v1932_v53   ;;  %2080 = vst [vmem:[#allocation3 + $0xb0] sm:$0xff] %v2012_v54   ;;  %v1169_v59 = vmul.f32 %v2564_v17, %v756_v57  ;;  %v1201_v60 = vmul.f32 %v2564_v17, %v884_v58  ;;  %v1303_v1 = vmax.f32 %v1239_v55, 0.0  ;;  %v1335_v2 = vmax.f32 %v1271_v56, 0.0 }
 0x13f   :  { %v758_v61 = vpop.f32.mrf.mxu0  ;;  %v886_v62 = vpop.f32.mrf.mxu1 }
 0x140   :  { %v1240_v63 = vadd.f32 %v2570_v21, %v1169_v59  ;;  %v1272_v0 = vadd.f32 %v2570_v21, %v1201_v60 }
 0x141   :  { %v761_v3 = vpop.f32.mrf.mxu0  ;;  %v889_v4 = vpop.f32.mrf.mxu1 }
 0x142   :  { %v1304_v5 = vmax.f32 %v1240_v63, 0.0  ;;  %v1336_v6 = vmax.f32 %v1272_v0, 0.0  ;;  %v1170_v7 = vmul.f32 %v2564_v17, %v761_v3  ;;  %v1202_v8 = vmul.f32 %v2564_v17, %v889_v4 }
 0x143   :  { %v763_v9 = vpop.f32.mrf.mxu0  ;;  %v891_v10 = vpop.f32.mrf.mxu1 }
 0x144   :  { %v1937_v11 = vpack.c.bf16 %v1304_v5, %v1303_v1  ;;  %v2017_v12 = vpack.c.bf16 %v1336_v6, %v1335_v2  ;;  %v1241_v13 = vadd.f32 %v2570_v21, %v1170_v7  ;;  %v1273_v14 = vadd.f32 %v2570_v21, %v1202_v8 }
 0x145   :  { %v764_v15 = vpop.f32.mrf.mxu0  ;;  %v892_v16 = vpop.f32.mrf.mxu1 }
 0x146   :  { %2065 = vst [vmem:[#allocation3 + $0x38] sm:$0xff] %v1937_v11   ;;  %2081 = vst [vmem:[#allocation3 + $0xb8] sm:$0xff] %v2017_v12   ;;  %v1171_v18 = vmul.f32 %v2564_v17, %v764_v15  ;;  %v1203_v19 = vmul.f32 %v2564_v17, %v892_v16  ;;  %v1305_v25 = vmax.f32 %v1241_v13, 0.0  ;;  %v1337_v26 = vmax.f32 %v1273_v14, 0.0 }
 0x147   :  { %v766_v20 = vpop.f32.mrf.mxu0  ;;  %v894_v22 = vpop.f32.mrf.mxu1 }
 0x148   :  { %v1242_v23 = vadd.f32 %v2570_v21, %v1171_v18  ;;  %v1274_v24 = vadd.f32 %v2570_v21, %v1203_v19 }
 0x149   :  { %v769_v27 = vpop.f32.mrf.mxu0  ;;  %v897_v28 = vpop.f32.mrf.mxu1 }
 0x14a   :  { %v1306_v29 = vmax.f32 %v1242_v23, 0.0  ;;  %v1338_v30 = vmax.f32 %v1274_v24, 0.0  ;;  %v1172_v31 = vmul.f32 %v2564_v17, %v769_v27  ;;  %v1204_v32 = vmul.f32 %v2564_v17, %v897_v28 }
 0x14b   :  { %v771_v33 = vpop.f32.mrf.mxu0  ;;  %v899_v34 = vpop.f32.mrf.mxu1 }
 0x14c   :  { %v1942_v35 = vpack.c.bf16 %v1306_v29, %v1305_v25  ;;  %v2022_v36 = vpack.c.bf16 %v1338_v30, %v1337_v26  ;;  %v1243_v37 = vadd.f32 %v2570_v21, %v1172_v31  ;;  %v1275_v38 = vadd.f32 %v2570_v21, %v1204_v32 }
 0x14d   :  { %v772_v39 = vpop.f32.mrf.mxu0  ;;  %v900_v40 = vpop.f32.mrf.mxu1 }
 0x14e   :  { %2066 = vst [vmem:[#allocation3 + $0x40] sm:$0xff] %v1942_v35   ;;  %2082 = vst [vmem:[#allocation3 + $0xc0] sm:$0xff] %v2022_v36   ;;  %v1173_v41 = vmul.f32 %v2564_v17, %v772_v39  ;;  %v1205_v42 = vmul.f32 %v2564_v17, %v900_v40  ;;  %v1307_v47 = vmax.f32 %v1243_v37, 0.0  ;;  %v1339_v48 = vmax.f32 %v1275_v38, 0.0 }
 0x14f   :  { %v774_v43 = vpop.f32.mrf.mxu0  ;;  %v902_v44 = vpop.f32.mrf.mxu1 }
 0x150   :  { %v1244_v45 = vadd.f32 %v2570_v21, %v1173_v41  ;;  %v1276_v46 = vadd.f32 %v2570_v21, %v1205_v42 }
 0x151   :  { %v777_v49 = vpop.f32.mrf.mxu0  ;;  %v905_v50 = vpop.f32.mrf.mxu1 }
 0x152   :  { %v1308_v51 = vmax.f32 %v1244_v45, 0.0  ;;  %v1340_v52 = vmax.f32 %v1276_v46, 0.0  ;;  %v1174_v53 = vmul.f32 %v2564_v17, %v777_v49  ;;  %v1206_v54 = vmul.f32 %v2564_v17, %v905_v50 }
 0x153   :  { %v779_v55 = vpop.f32.mrf.mxu0  ;;  %v907_v56 = vpop.f32.mrf.mxu1 }
 0x154   :  { %v1947_v57 = vpack.c.bf16 %v1308_v51, %v1307_v47  ;;  %v2027_v58 = vpack.c.bf16 %v1340_v52, %v1339_v48  ;;  %v1245_v59 = vadd.f32 %v2570_v21, %v1174_v53  ;;  %v1277_v60 = vadd.f32 %v2570_v21, %v1206_v54 }
 0x155   :  { %v780_v61 = vpop.f32.mrf.mxu0  ;;  %v908_v62 = vpop.f32.mrf.mxu1 }
 0x156   :  { %2067 = vst [vmem:[#allocation3 + $0x48] sm:$0xff] %v1947_v57   ;;  %2083 = vst [vmem:[#allocation3 + $0xc8] sm:$0xff] %v2027_v58   ;;  %v1175_v63 = vmul.f32 %v2564_v17, %v780_v61  ;;  %v1207_v0 = vmul.f32 %v2564_v17, %v908_v62  ;;  %v1309_v5 = vmax.f32 %v1245_v59, 0.0  ;;  %v1341_v6 = vmax.f32 %v1277_v60, 0.0 }
 0x157   :  { %v782_v1 = vpop.f32.mrf.mxu0  ;;  %v910_v2 = vpop.f32.mrf.mxu1 }
 0x158   :  { %v1246_v3 = vadd.f32 %v2570_v21, %v1175_v63  ;;  %v1278_v4 = vadd.f32 %v2570_v21, %v1207_v0 }
 0x159   :  { %v785_v7 = vpop.f32.mrf.mxu0  ;;  %v913_v8 = vpop.f32.mrf.mxu1 }
 0x15a   :  { %v1310_v9 = vmax.f32 %v1246_v3, 0.0  ;;  %v1342_v10 = vmax.f32 %v1278_v4, 0.0  ;;  %v1176_v11 = vmul.f32 %v2564_v17, %v785_v7  ;;  %v1208_v12 = vmul.f32 %v2564_v17, %v913_v8 }
 0x15b   :  { %v787_v13 = vpop.f32.mrf.mxu0  ;;  %v915_v14 = vpop.f32.mrf.mxu1 }
 0x15c   :  { %v1952_v15 = vpack.c.bf16 %v1310_v9, %v1309_v5  ;;  %v2032_v16 = vpack.c.bf16 %v1342_v10, %v1341_v6  ;;  %v1247_v18 = vadd.f32 %v2570_v21, %v1176_v11  ;;  %v1279_v19 = vadd.f32 %v2570_v21, %v1208_v12 }
 0x15d   :  { %v788_v20 = vpop.f32.mrf.mxu0  ;;  %v916_v22 = vpop.f32.mrf.mxu1 }
 0x15e   :  { %2068 = vst [vmem:[#allocation3 + $0x50] sm:$0xff] %v1952_v15   ;;  %2084 = vst [vmem:[#allocation3 + $0xd0] sm:$0xff] %v2032_v16   ;;  %v1177_v23 = vmul.f32 %v2564_v17, %v788_v20  ;;  %v1209_v24 = vmul.f32 %v2564_v17, %v916_v22  ;;  %v1311_v29 = vmax.f32 %v1247_v18, 0.0  ;;  %v1343_v30 = vmax.f32 %v1279_v19, 0.0 }
 0x15f   :  { %v790_v25 = vpop.f32.mrf.mxu0  ;;  %v918_v26 = vpop.f32.mrf.mxu1 }
 0x160   :  { %v1248_v27 = vadd.f32 %v2570_v21, %v1177_v23  ;;  %v1280_v28 = vadd.f32 %v2570_v21, %v1209_v24 }
 0x161   :  { %v793_v31 = vpop.f32.mrf.mxu0  ;;  %v921_v32 = vpop.f32.mrf.mxu1 }
 0x162   :  { %v1312_v33 = vmax.f32 %v1248_v27, 0.0  ;;  %v1344_v34 = vmax.f32 %v1280_v28, 0.0  ;;  %v1178_v35 = vmul.f32 %v2564_v17, %v793_v31  ;;  %v1210_v36 = vmul.f32 %v2564_v17, %v921_v32 }
 0x163   :  { %v795_v37 = vpop.f32.mrf.mxu0  ;;  %v923_v38 = vpop.f32.mrf.mxu1 }
 0x164   :  { %v1957_v39 = vpack.c.bf16 %v1312_v33, %v1311_v29  ;;  %v2037_v40 = vpack.c.bf16 %v1344_v34, %v1343_v30  ;;  %v1249_v41 = vadd.f32 %v2570_v21, %v1178_v35  ;;  %v1281_v42 = vadd.f32 %v2570_v21, %v1210_v36 }
 0x165   :  { %v796_v43 = vpop.f32.mrf.mxu0  ;;  %v924_v44 = vpop.f32.mrf.mxu1 }
 0x166   :  { %2069 = vst [vmem:[#allocation3 + $0x58] sm:$0xff] %v1957_v39   ;;  %2085 = vst [vmem:[#allocation3 + $0xd8] sm:$0xff] %v2037_v40   ;;  %v1179_v45 = vmul.f32 %v2564_v17, %v796_v43  ;;  %v1211_v46 = vmul.f32 %v2564_v17, %v924_v44  ;;  %v1313_v51 = vmax.f32 %v1249_v41, 0.0  ;;  %v1345_v52 = vmax.f32 %v1281_v42, 0.0 }
 0x167   :  { %v798_v47 = vpop.f32.mrf.mxu0  ;;  %v926_v48 = vpop.f32.mrf.mxu1 }
 0x168   :  { %v1250_v49 = vadd.f32 %v2570_v21, %v1179_v45  ;;  %v1282_v50 = vadd.f32 %v2570_v21, %v1211_v46 }
 0x169   :  { %v801_v53 = vpop.f32.mrf.mxu0  ;;  %v929_v54 = vpop.f32.mrf.mxu1 }
 0x16a   :  { %v1314_v55 = vmax.f32 %v1250_v49, 0.0  ;;  %v1346_v56 = vmax.f32 %v1282_v50, 0.0  ;;  %v1180_v57 = vmul.f32 %v2564_v17, %v801_v53  ;;  %v1212_v58 = vmul.f32 %v2564_v17, %v929_v54 }
 0x16b   :  { %v803_v59 = vpop.f32.mrf.mxu0  ;;  %v931_v60 = vpop.f32.mrf.mxu1 }
 0x16c   :  { %v1962_v61 = vpack.c.bf16 %v1314_v55, %v1313_v51  ;;  %v2042_v62 = vpack.c.bf16 %v1346_v56, %v1345_v52  ;;  %v1251_v63 = vadd.f32 %v2570_v21, %v1180_v57  ;;  %v1283_v0 = vadd.f32 %v2570_v21, %v1212_v58 }
 0x16d   :  { %v804_v1 = vpop.f32.mrf.mxu0  ;;  %v932_v2 = vpop.f32.mrf.mxu1 }
 0x16e   :  { %2070 = vst [vmem:[#allocation3 + $0x60] sm:$0xff] %v1962_v61   ;;  %2086 = vst [vmem:[#allocation3 + $0xe0] sm:$0xff] %v2042_v62   ;;  %v1181_v3 = vmul.f32 %v2564_v17, %v804_v1  ;;  %v1213_v4 = vmul.f32 %v2564_v17, %v932_v2  ;;  %v1315_v9 = vmax.f32 %v1251_v63, 0.0  ;;  %v1347_v10 = vmax.f32 %v1283_v0, 0.0 }
 0x16f   :  { %v806_v5 = vpop.f32.mrf.mxu0  ;;  %v934_v6 = vpop.f32.mrf.mxu1 }
 0x170   :  { %v1252_v7 = vadd.f32 %v2570_v21, %v1181_v3  ;;  %v1284_v8 = vadd.f32 %v2570_v21, %v1213_v4 }
 0x171   :  { %v809_v11 = vpop.f32.mrf.mxu0  ;;  %v937_v12 = vpop.f32.mrf.mxu1 }
 0x172   :  { %v1316_v13 = vmax.f32 %v1252_v7, 0.0  ;;  %v1348_v14 = vmax.f32 %v1284_v8, 0.0  ;;  %v1182_v15 = vmul.f32 %v2564_v17, %v809_v11  ;;  %v1214_v16 = vmul.f32 %v2564_v17, %v937_v12 }
 0x173   :  { %v811_v18 = vpop.f32.mrf.mxu0  ;;  %v939_v19 = vpop.f32.mrf.mxu1 }
 0x174   :  { %v1967_v20 = vpack.c.bf16 %v1316_v13, %v1315_v9  ;;  %v2047_v22 = vpack.c.bf16 %v1348_v14, %v1347_v10  ;;  %v1253_v23 = vadd.f32 %v2570_v21, %v1182_v15  ;;  %v1285_v24 = vadd.f32 %v2570_v21, %v1214_v16 }
 0x175   :  { %v812_v25 = vpop.f32.mrf.mxu0  ;;  %v940_v26 = vpop.f32.mrf.mxu1 }
 0x176   :  { %2071 = vst [vmem:[#allocation3 + $0x68] sm:$0xff] %v1967_v20   ;;  %2087 = vst [vmem:[#allocation3 + $0xe8] sm:$0xff] %v2047_v22   ;;  %v1183_v27 = vmul.f32 %v2564_v17, %v812_v25  ;;  %v1215_v28 = vmul.f32 %v2564_v17, %v940_v26  ;;  %v1317_v33 = vmax.f32 %v1253_v23, 0.0  ;;  %v1349_v34 = vmax.f32 %v1285_v24, 0.0 }
 0x177   :  { %v814_v29 = vpop.f32.mrf.mxu0  ;;  %v942_v30 = vpop.f32.mrf.mxu1 }
 0x178   :  { %v1254_v31 = vadd.f32 %v2570_v21, %v1183_v27  ;;  %v1286_v32 = vadd.f32 %v2570_v21, %v1215_v28 }
 0x179   :  { %v817_v35 = vpop.f32.mrf.mxu0  ;;  %v945_v36 = vpop.f32.mrf.mxu1 }
 0x17a   :  { %v1318_v37 = vmax.f32 %v1254_v31, 0.0  ;;  %v1350_v38 = vmax.f32 %v1286_v32, 0.0  ;;  %v1184_v39 = vmul.f32 %v2564_v17, %v817_v35  ;;  %v1216_v40 = vmul.f32 %v2564_v17, %v945_v36 }
 0x17b   :  { %v819_v41 = vpop.f32.mrf.mxu0  ;;  %v947_v42 = vpop.f32.mrf.mxu1 }
 0x17c   :  { %v1972_v43 = vpack.c.bf16 %v1318_v37, %v1317_v33  ;;  %v2052_v44 = vpack.c.bf16 %v1350_v38, %v1349_v34  ;;  %v1255_v47 = vadd.f32 %v2570_v21, %v1184_v39  ;;  %v1287_v48 = vadd.f32 %v2570_v21, %v1216_v40 }
 0x17d   :  { %v820_v45 = vpop.f32.mrf.mxu0  ;;  %v948_v46 = vpop.f32.mrf.mxu1 }
 0x17e   :  { %2072 = vst [vmem:[#allocation3 + $0x70] sm:$0xff] %v1972_v43   ;;  %2088 = vst [vmem:[#allocation3 + $0xf0] sm:$0xff] %v2052_v44   ;;  %v1185_v49 = vmul.f32 %v2564_v17, %v820_v45  ;;  %v1217_v50 = vmul.f32 %v2564_v17, %v948_v46  ;;  %v1319_v55 = vmax.f32 %v1255_v47, 0.0  ;;  %v1351_v56 = vmax.f32 %v1287_v48, 0.0 }
 0x17f   :  { %v822_v51 = vpop.f32.mrf.mxu0  ;;  %v950_v52 = vpop.f32.mrf.mxu1 }
 0x180   :  { %v1256_v53 = vadd.f32 %v2570_v21, %v1185_v49  ;;  %v1288_v54 = vadd.f32 %v2570_v21, %v1217_v50 }
 0x182   :  { %v1320_v57 = vmax.f32 %v1256_v53, 0.0  ;;  %v1352_v58 = vmax.f32 %v1288_v54, 0.0 }
 0x184   :  { %v1977_v59 = vpack.c.bf16 %v1320_v57, %v1319_v55  ;;  %v2057_v60 = vpack.c.bf16 %v1352_v58, %v1351_v56 }
 0x186   :  { %2073 = vst [vmem:[#allocation3 + $0x78] sm:$0xff] %v1977_v59   ;;  %2089 = vst [vmem:[#allocation3 + $0xf8] sm:$0xff] %v2057_v60  }
 0x187   :  { %2249 = shalt.err (!%p2246_p4)
}
 0x188   :  { %s2262_s18 = smov 64   ;;  %s2263_s19 = smov 4  }
 0x189   :  { %1684 = dma.vmem_to_hbm [thread:$0]  %s1679_s2, 4096, %s2706_s4, [#allocation4], %s2262_s18, %s2262_s18, %s2263_s19  }
 0x18a   :  { %2258 = dma.done.wait [#allocation4], 4096  }
 0x18b   :  { %2259 = vsyncadd [#allocation4], 4294963200 }
 0x18c   :  { %1688 = vsyncpa [#allocation4], 1 }

</bundles_post_ra>
